<compile_context>
chip_gen: v6e
topology: v6e:2x2x1
jax: 0.10.0
libtpu: 0.0.40
codegen_flags: <defaults>
</compile_context>

<pallas_src>
import math
from typing import NamedTuple, Optional

import jax
import jax.numpy as jnp
from jax.experimental import pallas as pl
from jax.experimental.pallas import tpu as pltpu


def _round_up(x: int, m: int) -> int:
    return (x + m - 1) // m * m


# ----------------------------- kernels ---------------------------------------

def ffn_resident_kernel(x_ref, w1_ref, b1_ref, w2_ref, b2_ref, o_ref):
    # Whole (padded) W1/W2/b1/b2 are VMEM-resident; grid iterates row tiles only.
    h = jnp.dot(x_ref[...], w1_ref[...], preferred_element_type=jnp.float32)
    h = jnp.maximum(h + b1_ref[...], 0.0)
    # dropout == identity (eval mode), see TODO above.
    out = jnp.dot(h.astype(x_ref.dtype), w2_ref[...],
                  preferred_element_type=jnp.float32)
    o_ref[...] = (out + b2_ref[...]).astype(o_ref.dtype)


def ffn_chunked_kernel(x_ref, w1_ref, b1_ref, w2_ref, b2_ref, o_ref, acc_ref):
    # d_ff is tiled on grid axis 1 ("arbitrary"); f32 accumulator in VMEM scratch.
    k = pl.program_id(1)

    @pl.when(k == 0)
    def _():
        acc_ref[...] = jnp.zeros_like(acc_ref)

    h = jnp.dot(x_ref[...], w1_ref[...], preferred_element_type=jnp.float32)
    h = jnp.maximum(h + b1_ref[...], 0.0)
    acc_ref[...] += jnp.dot(h.astype(x_ref.dtype), w2_ref[...],
                            preferred_element_type=jnp.float32)

    @pl.when(k == pl.num_programs(1) - 1)
    def _():
        o_ref[...] = (acc_ref[...] + b2_ref[...]).astype(o_ref.dtype)


# ----------------------------- parameters ------------------------------------

class FFNParams(NamedTuple):
    w1: jax.Array       # (d_model_pad, d_ff_pad)
    b1: jax.Array       # (1, d_ff_pad)
    w2: jax.Array       # (d_ff_pad, d_model_pad)
    b2: jax.Array       # (1, d_model_pad)
    d_model: int
    d_ff: int


def prepare_ffn_params(w1, b1, w2, b2, *, align: int = 256) -> FFNParams:
    """Pad weights/biases once (hoisted out of the per-call hot path).

    Weights are stored as (in_features, out_features) so the kernel computes
    x @ W directly (== PyTorch x @ weight.T with weight shaped (out, in)).
    """
    d_model, d_ff = w1.shape
    dmp = _round_up(d_model, align)
    dfp = _round_up(d_ff, align)

    def pad2(a, r, c):
        if a.shape == (r, c):
            return a
        return jnp.pad(a, ((0, r - a.shape[0]), (0, c - a.shape[1])))

    return FFNParams(
        w1=pad2(w1, dmp, dfp),
        b1=pad2(b1.reshape(1, -1), 1, dfp),
        w2=pad2(w2, dfp, dmp),
        b2=pad2(b2.reshape(1, -1), 1, dmp),
        d_model=d_model,
        d_ff=d_ff,
    )


# ----------------------------- config selection ------------------------------

def _vmem_caps():
    """(scoped-vmem ceiling, planning budget) derived from the chip's VMEM."""
    try:
        cap = int(pltpu.get_tpu_info().vmem_capacity_bytes)
    except Exception:
        cap = 64 << 20  # conservative default: v7x per-TC VMEM
    limit_cap = min(100 << 20, cap - (8 << 20))   # ~56 MiB on v7x, 100 MiB on v5e/v6e
    budget = int(limit_cap * 0.85)                # headroom for compiler internals
    return limit_cap, budget


def _select_config(M, dmp, dfp, itemsize, budget, tm_default=512,
                   force: Optional[str] = None):
    """Returns (tm, weights_resident, tf, estimated_vmem_bytes)."""
    # Row tile: large for arithmetic intensity, but keep >=2 row blocks when
    # possible so the "parallel" axis can shard across both v7x TensorCores.
    if M >= 2 * tm_default:
        tm0 = tm_default
    elif M > 8:
        tm0 = max(8, min(_round_up(M, 8), _round_up((M + 1) // 2, 8)))
    else:
        tm0 = 8

    def resident_bytes(tm):
        return (4 * tm * dmp * itemsize                        # x + out tiles (x2 buf)
                + 2 * (2 * dmp * dfp + dfp + dmp) * itemsize   # W1,W2,b1,b2 (x2 buf)
                + tm * dfp * (4 + itemsize))                   # hidden f32 + dtype copy

    def chunked_bytes(tm, tf):
        return (4 * tm * dmp * itemsize                        # x + out tiles (x2 buf)
                + 2 * (2 * dmp * tf + tf + dmp) * itemsize     # weight/bias chunks
                + tm * dmp * 4                                 # f32 accumulator scratch
                + tm * tf * (4 + itemsize))                    # hidden f32 + dtype copy

    # Descending row-tile candidates.
    tms = []
    t = tm0
    while True:
        tms.append(t)
        if t <= 8:
            break
        nxt = max(8, _round_up(t // 2, 8))
        if nxt == t:
            break
        t = nxt

    # d_ff chunk candidates: multiples of 256 that divide d_ff_pad, descending.
    tfs = [tf for tf in range(dfp, 0, -256) if dfp % tf == 0] or [dfp]

    if force == "resident":
        return tm0, True, dfp, resident_bytes(tm0)
    if force == "chunked":
        tf = tfs[-1]
        return tm0, False, tf, chunked_bytes(tm0, tf)

    res_tm = next((t for t in tms if resident_bytes(t) <= budget), None)
    chk = next(((t, tf) for t in tms for tf in tfs
                if chunked_bytes(t, tf) <= budget), None)

    # Prefer VMEM-resident weights (weights streamed from HBM once) unless the
    # row tile would have to shrink far below what the chunked path can use.
    if res_tm is not None and (chk is None or 4 * res_tm >= chk[0]):
        return res_tm, True, dfp, resident_bytes(res_tm)
    if chk is not None:
        return chk[0], False, chk[1], chunked_bytes(*chk)
    # Nothing fits the planning budget cleanly; use the smallest tiles.
    tf = tfs[-1]
    return 8, False, tf, chunked_bytes(8, tf)


# ----------------------------- entry point ------------------------------------

def feed_forward(x, params: FFNParams, *, tm: int = 512,
                 force: Optional[str] = None):
    """x: [batch, seq, d_model] -> [batch, seq, d_model]."""
    B, S, d_model = x.shape
    assert d_model == params.d_model, "x feature dim does not match params"
    dmp, dfp = params.w1.shape
    M = B * S
    dtype = x.dtype
    itemsize = jnp.dtype(dtype).itemsize

    limit_cap, budget = _vmem_caps()
    tm_eff, resident, tf_eff, need_bytes = _select_config(
        M, dmp, dfp, itemsize, budget, tm_default=tm, force=force)

    M_pad = _round_up(M, tm_eff)
    x2d = x.reshape(M, d_model)
    if M_pad != M or dmp != d_model:
        x2d = jnp.pad(x2d, ((0, M_pad - M), (0, dmp - d_model)))

    n_row = M_pad // tm_eff
    n_weight_streams = 1 if resident else n_row
    w_itemsize = jnp.dtype(params.w1.dtype).itemsize
    weight_bytes = (params.w1.size + params.b1.size
                    + params.w2.size + params.b2.size) * w_itemsize
    cost = pl.CostEstimate(
        flops=4 * M_pad * dmp * dfp,                 # two GEMMs
        transcendentals=0,
        bytes_accessed=(x2d.size + M_pad * dmp) * itemsize
                       + n_weight_streams * weight_bytes,
    )
    vmem_limit = min(limit_cap,
                     max(int(need_bytes * 1.25) + (4 << 20), 32 << 20))

    if resident:
        grid_spec = pltpu.PrefetchScalarGridSpec(
            num_scalar_prefetch=0,
            grid=(n_row,),
            in_specs=[
                pl.BlockSpec((tm_eff, dmp), lambda i: (i, 0)),   # x rows
                pl.BlockSpec((dmp, dfp), lambda i: (0, 0)),      # W1 (resident)
                pl.BlockSpec((1, dfp), lambda i: (0, 0)),        # b1 (resident)
                pl.BlockSpec((dfp, dmp), lambda i: (0, 0)),      # W2 (resident)
                pl.BlockSpec((1, dmp), lambda i: (0, 0)),        # b2 (resident)
            ],
            out_specs=pl.BlockSpec((tm_eff, dmp), lambda i: (i, 0)),
        )
        kernel = ffn_resident_kernel
        dim_sem = ("parallel",)
    else:
        grid_spec = pltpu.PrefetchScalarGridSpec(
            num_scalar_prefetch=0,
            grid=(n_row, dfp // tf_eff),
            in_specs=[
                pl.BlockSpec((tm_eff, dmp), lambda i, k: (i, 0)),   # x rows
                pl.BlockSpec((dmp, tf_eff), lambda i, k: (0, k)),   # W1 chunk
                pl.BlockSpec((1, tf_eff), lambda i, k: (0, k)),     # b1 chunk
                pl.BlockSpec((tf_eff, dmp), lambda i, k: (k, 0)),   # W2 chunk
                pl.BlockSpec((1, dmp), lambda i, k: (0, 0)),        # b2
            ],
            out_specs=pl.BlockSpec((tm_eff, dmp), lambda i, k: (i, 0)),
            scratch_shapes=[pltpu.VMEM((tm_eff, dmp), jnp.float32)],
        )
        kernel = ffn_chunked_kernel
        dim_sem = ("parallel", "arbitrary")

    out2d = pl.pallas_call(
        kernel,
        out_shape=jax.ShapeDtypeStruct((M_pad, dmp), dtype),
        grid_spec=grid_spec,
        compiler_params=pltpu.CompilerParams(
            dimension_semantics=dim_sem,
            vmem_limit_bytes=vmem_limit,
        ),
        cost_estimate=cost,
    )(x2d, params.w1, params.b1, params.w2, params.b2)

    return out2d[:M, :d_model].reshape(B, S, d_model)


# ----------------------------- test harness -----------------------------------

def xavier_uniform(key, fan_in, fan_out, dtype=jnp.float32):
    # matches torch.nn.init.xavier_uniform_ for a (fan_in, fan_out) matrix
    limit = math.sqrt(6.0 / (fan_in + fan_out))
    return jax.random.uniform(key, (fan_in, fan_out), dtype, -limit, limit)


if __name__ == "__main__":
    # Small shapes consistent with the module's forward: [batch, seq, d_model]
    batch, seq, d_model, d_ff = 2, 8, 32, 64

    key = jax.random.PRNGKey(0)
    kx, kw1, kw2, kb1, kb2 = jax.random.split(key, 5)

    x = jax.random.normal(kx, (batch, seq, d_model), jnp.float32)
    w1 = xavier_uniform(kw1, d_model, d_ff)
    w2 = xavier_uniform(kw2, d_ff, d_model)
    # nn.Linear default bias init: U(-1/sqrt(fan_in), 1/sqrt(fan_in))
    b1 = jax.random.uniform(kb1, (d_ff,), jnp.float32,
                            -1.0 / math.sqrt(d_model), 1.0 / math.sqrt(d_model))
    b2 = jax.random.uniform(kb2, (d_model,), jnp.float32,
                            -1.0 / math.sqrt(d_ff), 1.0 / math.sqrt(d_ff))

    # Padding is done once, outside the per-call hot path.
    params = prepare_ffn_params(w1, b1, w2, b2)

    # Pure-JAX reference (inference mode: dropout == identity)
    ref = jnp.maximum(x @ w1 + b1, 0.0) @ w2 + b2

    # Default (auto-selected, weights-resident) path.
    out = feed_forward(x, params)
    jax.block_until_ready(out)
    assert out.shape == (batch, seq, d_model)
    assert jnp.allclose(out, ref, atol=1e-5, rtol=1e-5), \
        f"resident path: max err {jnp.max(jnp.abs(out - ref))}"

    # Also exercise the chunked (accumulator) fallback path for coverage.
    out_chunked = feed_forward(x, params, force="chunked")
    jax.block_until_ready(out_chunked)
    assert jnp.allclose(out_chunked, ref, atol=1e-5, rtol=1e-5), \
        f"chunked path: max err {jnp.max(jnp.abs(out_chunked - ref))}"

    print("KERNEL_OK")
</pallas_src>

<mosaic_0001>
module attributes {stable_mosaic.version = 11 : i64} {
  func.func @ffn_resident_kernel(%arg0: i32, %arg1: memref<8x256xf32, #tpu.memory_space<vmem>>, %arg2: memref<256x256xf32, #tpu.memory_space<vmem>>, %arg3: memref<1x256xf32, #tpu.memory_space<vmem>>, %arg4: memref<256x256xf32, #tpu.memory_space<vmem>>, %arg5: memref<1x256xf32, #tpu.memory_space<vmem>>, %arg6: memref<8x256xf32, #tpu.memory_space<vmem>>) attributes {dimension_semantics = [#tpu.dimension_semantics<parallel>], iteration_bounds = array<i64: 2>, scalar_prefetch = 0 : i64, scratch_operands = 0 : i64, tpu.core_type = #tpu.core_type<tc>, window_params = [{transform_indices = @transform_0, window_bounds = array<i64: 8, 256>}, {pipeline_mode = #tpu.pipeline_mode<synchronous>, transform_indices = @transform_1, window_bounds = array<i64: 256, 256>}, {pipeline_mode = #tpu.pipeline_mode<synchronous>, transform_indices = @transform_2, window_bounds = array<i64: 1, 256>}, {pipeline_mode = #tpu.pipeline_mode<synchronous>, transform_indices = @transform_3, window_bounds = array<i64: 256, 256>}, {pipeline_mode = #tpu.pipeline_mode<synchronous>, transform_indices = @transform_4, window_bounds = array<i64: 1, 256>}, {transform_indices = @transform_5, window_bounds = array<i64: 8, 256>}]} {
    %c0 = arith.constant 0 : index
    %c0_0 = arith.constant 0 : index
    %0 = vector.load %arg1[%c0, %c0_0] : memref<8x256xf32, #tpu.memory_space<vmem>>, vector<8x256xf32>
    %c0_1 = arith.constant 0 : index
    %c0_2 = arith.constant 0 : index
    %1 = vector.load %arg2[%c0_1, %c0_2] : memref<256x256xf32, #tpu.memory_space<vmem>>, vector<256x256xf32>
    %cst = arith.constant dense<0.000000e+00> : vector<8x256xf32>
    %2 = tpu.matmul %0, %1, %cst {dimension_numbers = #tpu.dot_dimension_numbers<[1], [0], [0], [1], [0, 0, 1, 1], [], []>} : vector<8x256xf32>, vector<256x256xf32>, vector<8x256xf32> -> vector<8x256xf32>
    %c0_3 = arith.constant 0 : index
    %c0_4 = arith.constant 0 : index
    %3 = vector.load %arg3[%c0_3, %c0_4] : memref<1x256xf32, #tpu.memory_space<vmem>>, vector<1x256xf32>
    %4 = vector.broadcast %3 : vector<1x256xf32> to vector<8x256xf32>
    %5 = arith.addf %2, %4 : vector<8x256xf32>
    %cst_5 = arith.constant 0.000000e+00 : f32
    %6 = vector.broadcast %cst_5 : f32 to vector<8x256xf32>
    %7 = arith.maximumf %5, %6 : vector<8x256xf32>
    %c0_6 = arith.constant 0 : index
    %c0_7 = arith.constant 0 : index
    %8 = vector.load %arg4[%c0_6, %c0_7] : memref<256x256xf32, #tpu.memory_space<vmem>>, vector<256x256xf32>
    %cst_8 = arith.constant dense<0.000000e+00> : vector<8x256xf32>
    %9 = tpu.matmul %7, %8, %cst_8 {dimension_numbers = #tpu.dot_dimension_numbers<[1], [0], [0], [1], [0, 0, 1, 1], [], []>} : vector<8x256xf32>, vector<256x256xf32>, vector<8x256xf32> -> vector<8x256xf32>
    %c0_9 = arith.constant 0 : index
    %c0_10 = arith.constant 0 : index
    %10 = vector.load %arg5[%c0_9, %c0_10] : memref<1x256xf32, #tpu.memory_space<vmem>>, vector<1x256xf32>
    %11 = vector.broadcast %10 : vector<1x256xf32> to vector<8x256xf32>
    %12 = arith.addf %9, %11 : vector<8x256xf32>
    %c0_11 = arith.constant 0 : index
    %c0_12 = arith.constant 0 : index
    %13 = vector.load %arg6[%c0_11, %c0_12] : memref<8x256xf32, #tpu.memory_space<vmem>>, vector<8x256xf32>
    tpu.vector_store %arg6[%c0_11, %c0_12], %12 {strides = array<i32>} : memref<8x256xf32, #tpu.memory_space<vmem>>, vector<8x256xf32>,
    return
  }
  func.func @transform_0(%arg0: i32) -> (i32, i32) {
    %c0_i32 = arith.constant 0 : i32
    %c0_i32_0 = arith.constant 0 : i32
    return %arg0, %c0_i32 : i32, i32
  }
  func.func @transform_1(%arg0: i32) -> (i32, i32) {
    %c0_i32 = arith.constant 0 : i32
    %c0_i32_0 = arith.constant 0 : i32
    %c0_i32_1 = arith.constant 0 : i32
    return %c0_i32, %c0_i32_0 : i32, i32
  }
  func.func @transform_2(%arg0: i32) -> (i32, i32) {
    %c0_i32 = arith.constant 0 : i32
    %c0_i32_0 = arith.constant 0 : i32
    %c0_i32_1 = arith.constant 0 : i32
    return %c0_i32, %c0_i32_0 : i32, i32
  }
  func.func @transform_3(%arg0: i32) -> (i32, i32) {
    %c0_i32 = arith.constant 0 : i32
    %c0_i32_0 = arith.constant 0 : i32
    %c0_i32_1 = arith.constant 0 : i32
    return %c0_i32, %c0_i32_0 : i32, i32
  }
  func.func @transform_4(%arg0: i32) -> (i32, i32) {
    %c0_i32 = arith.constant 0 : i32
    %c0_i32_0 = arith.constant 0 : i32
    %c0_i32_1 = arith.constant 0 : i32
    return %c0_i32, %c0_i32_0 : i32, i32
  }
  func.func @transform_5(%arg0: i32) -> (i32, i32) {
    %c0_i32 = arith.constant 0 : i32
    %c0_i32_0 = arith.constant 0 : i32
    return %arg0, %c0_i32 : i32, i32
  }
}

</mosaic_0001>

<bundles_post_ra>
// kernel: tpu_custom_call.1
= control target key start
LH: loop header
LB: loop body
LE: loop exit
PB: predicated region body
PF: predicated region fallthrough
CT: control target
= control target key end

     0   :  { %10 = vsyncpa [#allocation3], 0  ;;  %s1128_s0 = inlined_call_operand.hbm [shape: f32[16,256], index: 0, kind: input, shape index: {}]   ;;  %s1129_s1 = inlined_call_operand.hbm [shape: f32[256,256], index: 1, kind: input, shape index: {}]   ;;  %s1130_s2 = inlined_call_operand.vmem [shape: f32[1,256], index: 2, kind: input, shape index: {}]   ;;  %s1131_s3 = inlined_call_operand.hbm [shape: f32[256,256], index: 3, kind: input, shape index: {}]   ;;  %s1132_s4 = inlined_call_operand.vmem [shape: f32[1,256], index: 4, kind: input, shape index: {}]   ;;  %s1133_s5 = inlined_call_operand.hbm [shape: f32[16,256], index: 5, kind: output, shape index: {}]  }
   0x1   :  { %12 = vsyncpa [#allocation3 + $0x1], 0 }
   0x2   :  { %13 = vsyncpa [#allocation6], 0 }
   0x3   :  { %14 = vsyncpa [#allocation4], 0 }
   0x4   :  { %16 = vsyncpa [#allocation4 + $0x1], 0  ;;  %s949_s18 = smov 0   ;;  %s951_s19 = smov 0  }
   0x5   :  { %s953_s20 = smov 0   ;;  %s955_s21 = smov 0  }
   0x6 LB: > { %s970_s22 = sadd.s32 4294967295, %s911_s21   ;;  %s674_s23 = sadd.s32 4294967294, %s911_s21   ;;  %s911_s21 = sphi %s955_s21, %s1155_s21   ;;  %s907_s20 = sphi %s953_s20, %s1154_s20   ;;  %s903_s19 = sphi %s951_s19, %s1153_s19   ;;  %s899_s18 = sphi %s949_s18, %s1152_s18  }
   0x7   : > { %p42_p0 = scmp.ne.s32.totalorder %s903_s19, %s899_s18  ;;  %p1134_p1 = scmp.eq.s32.totalorder %s970_s22, 0 }
   0x8   : > { %p156_p3 = scmp.eq.s32.totalorder %s674_s23, 1  ;;  %p675_p5 = scmp.ge.s32.totalorder %s911_s21, 1 }
   0x9   : > { %p979_p4 = por %p1134_p1, %p42_p0  ;;  %p163_p7 = scmp.lt.s32.totalorder %s911_s21, 3 }
   0xa   : > { %p984_p6 = por %p156_p3, %p42_p0  ;;  %s913_s27 = smov [#allocation5]  }
   0xb   : > { %s1138_s24 = scalar_select %p979_p4, 1, 0 }
   0xc   : > { %s1139_s25 = scalar_select %p984_p6, 1, 0 }
   0xd   : > { %p989_p8 = pnand %p675_p5, %p163_p7  ;;  %s175_s28 = sshll.u32 %s913_s27, 4  ;;  %s176_s28 = int_to_ptr.vmem [resolvable:$true] %s175_s28 }
   0xe   : > { %s914_s30 = smov [#allocation7]   ;;  %s774_s7 = scalar_lea.vmem %s176_s28, 8192 }
   0xf   : > { %s1140_s26 = scalar_select %p989_p8, 1, 0 }
  0x10   : > { %p706_p9 = pneg %p989_p8  ;;  %s191_s6 = sshll.u32 %s914_s30, 4  ;;  %s192_s6 = int_to_ptr.vmem [resolvable:$true] %s191_s6 }
  0x11   : > { %p775_p13 = scmp.ne.s32.totalorder %s176_s28, %s774_s7  ;;  %p782_p5 = scmp.lt.s32.totalorder %s176_s28, %s176_s28 }
  0x12   : > { %p998_p11 = pnand %p706_p9, %p1134_p1  ;;  %p783_p7 = scmp.lt.s32.totalorder %s774_s7, %s774_s7 }
  0x14   : > { %p765_p12 = pneg %p998_p11  ;;  %p784_p10 = por %p783_p7, %p782_p5 }
  0x16   : > { %p777_p0 = pnand %p775_p13, %p765_p12 }
  0x18   : > { %p778_p3 = pneg %p777_p0 }
  0x1a   : > { %p785_p9 = pnand %p784_p10, %p778_p3 }
  0x1c   : > { %788 = shalt.err (!%p785_p9)
}
  0x1d   : > { %s915_s8 = smov 256   ;;  %s916_s9 = smov 16  }
  0x1e   : > { %709 = dma.hbm_to_vmem [thread:$0]  (!%p998_p11), %s1129_s1, 8192, %s176_s28, [#allocation6], %s915_s8, %s915_s8, %s916_s9  }
  0x1f   : > { %s800_s12 = scalar_lea.vmem %s192_s6, 8192  ;;  %p808_p2 = scmp.lt.s32.totalorder %s192_s6, %s192_s6 }
  0x20   : > { %p801_p1 = scmp.ne.s32.totalorder %s192_s6, %s800_s12  ;;  %p809_p6 = scmp.lt.s32.totalorder %s800_s12, %s800_s12 }
  0x22   : > { %p803_p13 = pnand %p801_p1, %p765_p12  ;;  %p810_p5 = por %p809_p6, %p808_p2 }
  0x24   : > { %p804_p0 = pneg %p803_p13 }
  0x26   : > { %p811_p10 = pnand %p810_p5, %p804_p0 }
  0x28   : > { %814 = shalt.err (!%p811_p10)
}
  0x29   : > { %712 = dma.hbm_to_vmem [thread:$0]  (!%p998_p11), %s1131_s3, 8192, %s192_s6, [#allocation6], %s915_s8, %s915_s8, %s916_s9  }
  0x2a   : > { %s1021_s15 = sadd.s32 1, %s911_s21   ;;  %s29_s16 = sadd.s32 1, %s907_s20 }
  0x2b   : > { %s26_s17 = ssub.s32 %s911_s21, %s1021_s15  ;;  %p36_p1 = scmp.ne.s32.totalorder %s907_s20, %s903_s19 }
  0x2c   : > { %p27_p2 = scmp.eq.s32.totalorder %s26_s17, 0  ;;  %p37_p6 = scmp.eq.s32.totalorder %s911_s21, 0 }
  0x2d   : > { %p1142_p12 = scmp.eq.s32.totalorder %s970_s22, 1  ;;  %p723_p7 = scmp.lt.s32.totalorder %s911_s21, 2 }
  0x2e   : > { %s1037_s27 = scalar_select %p27_p2, %s907_s20, %s29_s16  }
  0x2f   : > { %p1031_p3 = por %p1142_p12, %p36_p1  ;;  %p38_p9 = por %p37_p6, %p36_p1 }
  0x30   : > { %s208_s28 = sand.u32 1, %s907_s20   ;;  %s692_s30 = sshll.u32 %s911_s21, 8 }
  0x31   : > { %s1143_s23 = scalar_select %p1031_p3, 1, 0 }
  0x32   : > { %s679_s29 = sshll.u32 %s208_s28, 4  ;;  %s1044_s8 = scalar_lea.hbm %s1128_s0, %s692_s30 }
  0x33   : > { %s212_s9 = scalar_lea.vmem [#allocation2], %s679_s29  ;;  %p1046_p11 = pnand %p723_p7, %p38_p9 }
  0x34   : > { %s220_s10 = sshll.u32 %s212_s9, 4  ;;  %s209_s12 = scalar_lea.sflag [#allocation3], %s208_s28  ;;  %s221_s10 = int_to_ptr.vmem [resolvable:$true] %s220_s10 }
  0x35   : > { %s815_s13 = scalar_lea.hbm %s1044_s8, 256  ;;  %p817_p0 = pneg %p1046_p11 }
  0x36   : > { %p816_p13 = scmp.ne.s32.totalorder %s1044_s8, %s815_s13  ;;  %s820_s17 = scalar_lea.hbm %s1128_s0, 512 }
  0x37   : > { %p821_p1 = scmp.lt.s32.totalorder %s1044_s8, %s1128_s0  ;;  %p822_p2 = scmp.lt.s32.totalorder %s820_s17, %s815_s13 }
  0x38   : > { %p818_p5 = pnand %p817_p0, %p816_p13 }
  0x39   : > { %p823_p6 = por %p822_p2, %p821_p1 }
  0x3a   : > { %p819_p10 = pneg %p818_p5 }
  0x3c   : > { %p824_p12 = pnand %p823_p6, %p819_p10 }
  0x3e   : > { %827 = shalt.err (!%p824_p12)
}
  0x3f   : > { %s828_s6 = scalar_lea.vmem %s221_s10, 256  ;;  %s917_s28 = smov [#allocation2]  }
  0x40   : > { %p829_p7 = scmp.ne.s32.totalorder %s221_s10, %s828_s6  ;;  %s833_s7 = sshll.u32 %s917_s28, 4  ;;  %s834_s7 = int_to_ptr.vmem [resolvable:$false] %s833_s7 }
  0x41   : > { %s835_s9 = scalar_lea.vmem %s834_s7, 512  ;;  %p836_p13 = scmp.lt.s32.totalorder %s221_s10, %s834_s7 }
  0x42   : > { %p831_p9 = pnand %p829_p7, %p817_p0  ;;  %p837_p5 = scmp.lt.s32.totalorder %s835_s9, %s828_s6 }
  0x44   : > { %p832_p3 = pneg %p831_p9  ;;  %p838_p4 = por %p837_p5, %p836_p13 }
  0x46   : > { %p839_p8 = pnand %p838_p4, %p832_p3 }
  0x48   : > { %842 = shalt.err (!%p839_p8)
}
  0x49   : > { %716 = dma.hbm_to_vmem [thread:$0]  (!%p1046_p11), %s1044_s8, 256, %s221_s10, %s209_s12  }
  0x4a   : > { %p1145_p10 = scmp.ne.s32.totalorder %s1140_s26, 0 }
  0x4b   : > { %s1067_s13 = sand.u32 (!%p1145_p10), 1, %s903_s19   ;;  %p1146_p4 = scmp.ne.s32.totalorder (!%p1145_p10), %s1138_s24, 0 }
  0x4c   : > { %229 = sbr.rel (%p1145_p10) target bundleno = 560 (0x230), region = 40  ;;  %s683_s14 = sshll.u32 (!%p1145_p10), %s1067_s13, 4 }
  0x4d   : > { %s232_s16 = scalar_lea.sflag (!%p1145_p10), [#allocation3], %s1067_s13  ;;  %s1073_s17 = scalar_lea.vmem (!%p1145_p10), [#allocation2], %s683_s14 }
  0x51   : > { %886 = dma.done.wait (%p1146_p4), %s232_s16, 256  }
  0x52   : > { %888 = vsyncadd (%p1146_p4), %s232_s16, 4294967040  ;;  %p1147_p8 = scmp.eq.s32.totalorder %s970_s22, 0 }
  0x54   : > { %890 = dma.done.wait (%p1147_p8), [#allocation6], 16384   ;;  %p1148_p3 = pmov %p1147_p8 }
  0x55   : > { %v303_v0 = vld [vmem:[#allocation5 + $0xf8] sm:$0xff]  ;;  %v302_v1 = vld [vmem:[#allocation5 + $0xf0] sm:$0xff]  ;;  %v301_v2 = vld [vmem:[#allocation5 + $0xe8] sm:$0xff]  ;;  %s693_s11 = sshll.u32 %s970_s22, 8  ;;  %s269_s12 = scalar_lea.vmem [#allocation8], %s683_s14 }
  0x56   : > { %892 = vsyncadd (%p1148_p3), [#allocation6], 4294950912  ;;  %348 = vmatprep.subr.mxu0 %v303_v0  ;;  %v300_v3 = vld [vmem:[#allocation5 + $0xe0] sm:$0xff]  ;;  %v299_v4 = vld [vmem:[#allocation5 + $0xd8] sm:$0xff]  ;;  %s585_s30 = sshll.u32 %s269_s12, 4  ;;  %s583_s28 = scalar_lea.hbm %s1133_s5, %s693_s11  ;;  %s586_s30 = int_to_ptr.vmem [resolvable:$true] %s585_s30 }
  0x57   : > { %349 = vmatpush1.msra.mxu0 %v302_v1  ;;  %v298_v5 = vld [vmem:[#allocation5 + $0xd0] sm:$0xff]  ;;  %v297_v6 = vld [vmem:[#allocation5 + $0xc8] sm:$0xff]  ;;  %v296_v7 = vld [vmem:[#allocation5 + $0xc0] sm:$0xff]  ;;  %s571_s7 = scalar_lea.sflag [#allocation4], %s1067_s13  ;;  %s843_s9 = scalar_lea.vmem %s586_s30, 256 }
  0x58   : > { %350 = vmatprep.subr.mxu0 %v301_v2  ;;  %v295_v8 = vld [vmem:[#allocation5 + $0xb8] sm:$0xff]  ;;  %v294_v9 = vld [vmem:[#allocation5 + $0xb0] sm:$0xff]  ;;  %v293_v10 = vld [vmem:[#allocation5 + $0xa8] sm:$0xff]  ;;  %p844_p11 = scmp.ne.s32.totalorder %s586_s30, %s843_s9  ;;  %p1149_p0 = scmp.ne.s32.totalorder %s1143_s23, 0 }
  0x59   : > { %351 = vmatpush1.msra.mxu0 %v300_v3  ;;  %v292_v11 = vld [vmem:[#allocation5 + $0xa0] sm:$0xff]  ;;  %v291_v12 = vld [vmem:[#allocation5 + $0x98] sm:$0xff]  ;;  %v290_v13 = vld [vmem:[#allocation5 + $0x90] sm:$0xff]  ;;  %s918_s22 = smov [#allocation8]  }
  0x5a   : > { %352 = vmatprep.subr.mxu0 %v299_v4  ;;  %v289_v14 = vld [vmem:[#allocation5 + $0x88] sm:$0xff]  ;;  %v288_v15 = vld [vmem:[#allocation5 + $0x80] sm:$0xff]  ;;  %v287_v16 = vld [vmem:[#allocation5 + $0x78] sm:$0xff]  ;;  %p845_p1 = pnand %p844_p11, %p1149_p0  ;;  %s847_s16 = sshll.u32 %s918_s22, 4  ;;  %s848_s16 = int_to_ptr.vmem [resolvable:$false] %s847_s16 }
  0x5b   : > { %353 = vmatpush1.msra.mxu0 %v298_v5  ;;  %v286_v17 = vld [vmem:[#allocation5 + $0x70] sm:$0xff]  ;;  %v285_v18 = vld [vmem:[#allocation5 + $0x68] sm:$0xff]  ;;  %v284_v19 = vld [vmem:[#allocation5 + $0x60] sm:$0xff]  ;;  %s849_s14 = scalar_lea.vmem %s848_s16, 512  ;;  %p850_p6 = scmp.lt.s32.totalorder %s586_s30, %s848_s16 }
  0x5c   : > { %354 = vmatprep.subr.mxu0 %v297_v6  ;;  %v283_v20 = vld [vmem:[#allocation5 + $0x58] sm:$0xff]  ;;  %v282_v21 = vld [vmem:[#allocation5 + $0x50] sm:$0xff]  ;;  %v281_v22 = vld [vmem:[#allocation5 + $0x48] sm:$0xff]  ;;  %p846_p2 = pneg %p845_p1  ;;  %p851_p12 = scmp.lt.s32.totalorder %s849_s14, %s843_s9 }
  0x5d   : > { %355 = vmatpush1.msra.mxu0 %v296_v7  ;;  %v280_v23 = vld [vmem:[#allocation5 + $0x40] sm:$0xff]  ;;  %v279_v24 = vld [vmem:[#allocation5 + $0x38] sm:$0xff]  ;;  %v451_v27 = vld [vmem:[#allocation7 + $0xf0] sm:$0xff] }
  0x5e   : > { %356 = vmatprep.subr.mxu0 %v295_v8  ;;  %v271_v25 = vld [vmem:[%s1073_s17 + $0x8] sm:$0xff]  ;;  %v278_v29 = vld [vmem:[#allocation5 + $0x30] sm:$0xff]  ;;  %v449_v30 = vld [vmem:[#allocation7 + $0xe0] sm:$0xff]  ;;  %p852_p7 = por %p851_p12, %p850_p6 }
  0x5f   : > { %357 = vmatpush1.msra.mxu0 %v294_v9  ;;  %412 = vmatprep.mubr.f32.mxu0 %v271_v25  ;;  %v452_v26 = vld [vmem:[#allocation7 + $0xf8] sm:$0xff]  ;;  %v450_v28 = vld [vmem:[#allocation7 + $0xe8] sm:$0xff]  ;;  %v276_v33 = vld [vmem:[#allocation5 + $0x20] sm:$0xff] }
  0x60   : > { %358 = vmatprep.subr.mxu0 %v293_v10  ;;  %497 = vmatprep.subr.mxu1 %v452_v26  ;;  %v277_v31 = vld [vmem:[#allocation5 + $0x28] sm:$0xff]  ;;  %v448_v32 = vld [vmem:[#allocation7 + $0xd8] sm:$0xff]  ;;  %v447_v34 = vld [vmem:[#allocation7 + $0xd0] sm:$0xff]  ;;  %p853_p9 = pnand %p852_p7, %p846_p2 }
  0x61   : > { %359 = vmatpush1.msra.mxu0 %v292_v11  ;;  %498 = vmatpush1.msra.mxu1 %v451_v27  ;;  %v275_v35 = vld [vmem:[#allocation5 + $0x18] sm:$0xff]  ;;  %v446_v36 = vld [vmem:[#allocation7 + $0xc8] sm:$0xff]  ;;  %v274_v37 = vld [vmem:[#allocation5 + $0x10] sm:$0xff] }
  0x62   : > { %360 = vmatprep.subr.mxu0 %v291_v12  ;;  %499 = vmatprep.subr.mxu1 %v450_v28  ;;  %v445_v38 = vld [vmem:[#allocation7 + $0xc0] sm:$0xff]  ;;  %v273_v39 = vld [vmem:[#allocation5 + $0x8] sm:$0xff]  ;;  %v444_v40 = vld [vmem:[#allocation7 + $0xb8] sm:$0xff] }
  0x63   : > { %361 = vmatpush1.msra.mxu0 %v290_v13  ;;  %500 = vmatpush1.msra.mxu1 %v449_v30  ;;  %v272_v41 = vld [vmem:[#allocation5] sm:$0xff]  ;;  %v443_v42 = vld [vmem:[#allocation7 + $0xb0] sm:$0xff]  ;;  %v335_v43 = vld [vmem:[#allocation5 + $0x1f8] sm:$0xff] }
  0x64   : > { %362 = vmatprep.subr.mxu0 %v289_v14  ;;  %501 = vmatprep.subr.mxu1 %v448_v32  ;;  %v442_v44 = vld [vmem:[#allocation7 + $0xa8] sm:$0xff]  ;;  %v334_v45 = vld [vmem:[#allocation5 + $0x1f0] sm:$0xff]  ;;  %v441_v46 = vld [vmem:[#allocation7 + $0xa0] sm:$0xff] }
  0x65   : > { %363 = vmatpush1.msra.mxu0 %v288_v15  ;;  %502 = vmatpush1.msra.mxu1 %v447_v34  ;;  %v333_v47 = vld [vmem:[#allocation5 + $0x1e8] sm:$0xff]  ;;  %v440_v48 = vld [vmem:[#allocation7 + $0x98] sm:$0xff]  ;;  %v332_v49 = vld [vmem:[#allocation5 + $0x1e0] sm:$0xff] }
  0x66   : > { %364 = vmatprep.subr.mxu0 %v287_v16  ;;  %503 = vmatprep.subr.mxu1 %v446_v36  ;;  %v439_v50 = vld [vmem:[#allocation7 + $0x90] sm:$0xff]  ;;  %v331_v51 = vld [vmem:[#allocation5 + $0x1d8] sm:$0xff]  ;;  %v438_v52 = vld [vmem:[#allocation7 + $0x88] sm:$0xff] }
  0x67   : > { %365 = vmatpush1.msra.mxu0 %v286_v17  ;;  %504 = vmatpush1.msra.mxu1 %v445_v38  ;;  %v330_v53 = vld [vmem:[#allocation5 + $0x1d0] sm:$0xff]  ;;  %v437_v54 = vld [vmem:[#allocation7 + $0x80] sm:$0xff]  ;;  %v329_v55 = vld [vmem:[#allocation5 + $0x1c8] sm:$0xff] }
  0x68   : > { %366 = vmatprep.subr.mxu0 %v285_v18  ;;  %505 = vmatprep.subr.mxu1 %v444_v40  ;;  %v436_v56 = vld [vmem:[#allocation7 + $0x78] sm:$0xff]  ;;  %v328_v57 = vld [vmem:[#allocation5 + $0x1c0] sm:$0xff]  ;;  %v435_v58 = vld [vmem:[#allocation7 + $0x70] sm:$0xff] }
  0x69   : > { %367 = vmatpush1.msra.mxu0 %v284_v19  ;;  %506 = vmatpush1.msra.mxu1 %v443_v42  ;;  %v327_v59 = vld [vmem:[#allocation5 + $0x1b8] sm:$0xff]  ;;  %v434_v60 = vld [vmem:[#allocation7 + $0x68] sm:$0xff]  ;;  %v326_v61 = vld [vmem:[#allocation5 + $0x1b0] sm:$0xff] }
  0x6a   : > { %368 = vmatprep.subr.mxu0 %v283_v20  ;;  %507 = vmatprep.subr.mxu1 %v442_v44  ;;  %v433_v62 = vld [vmem:[#allocation7 + $0x60] sm:$0xff]  ;;  %v325_v63 = vld [vmem:[#allocation5 + $0x1a8] sm:$0xff]  ;;  %v432_v0 = vld [vmem:[#allocation7 + $0x58] sm:$0xff] }
  0x6b   : > { %369 = vmatpush1.msra.mxu0 %v282_v21  ;;  %508 = vmatpush1.msra.mxu1 %v441_v46  ;;  %v324_v1 = vld [vmem:[#allocation5 + $0x1a0] sm:$0xff]  ;;  %v431_v2 = vld [vmem:[#allocation7 + $0x50] sm:$0xff]  ;;  %v323_v3 = vld [vmem:[#allocation5 + $0x198] sm:$0xff] }
  0x6c   : > { %370 = vmatprep.subr.mxu0 %v281_v22  ;;  %509 = vmatprep.subr.mxu1 %v440_v48  ;;  %v430_v4 = vld [vmem:[#allocation7 + $0x48] sm:$0xff]  ;;  %v322_v5 = vld [vmem:[#allocation5 + $0x190] sm:$0xff]  ;;  %v429_v6 = vld [vmem:[#allocation7 + $0x40] sm:$0xff] }
  0x6d   : > { %371 = vmatpush1.msra.mxu0 %v280_v23  ;;  %510 = vmatpush1.msra.mxu1 %v439_v50  ;;  %v321_v7 = vld [vmem:[#allocation5 + $0x188] sm:$0xff]  ;;  %v428_v8 = vld [vmem:[#allocation7 + $0x38] sm:$0xff]  ;;  %v320_v9 = vld [vmem:[#allocation5 + $0x180] sm:$0xff] }
  0x6e   : > { %372 = vmatprep.subr.mxu0 %v279_v24  ;;  %511 = vmatprep.subr.mxu1 %v438_v52  ;;  %v427_v10 = vld [vmem:[#allocation7 + $0x30] sm:$0xff]  ;;  %v319_v11 = vld [vmem:[#allocation5 + $0x178] sm:$0xff]  ;;  %v426_v12 = vld [vmem:[#allocation7 + $0x28] sm:$0xff] }
  0x6f   : > { %373 = vmatpush1.msra.mxu0 %v278_v29  ;;  %512 = vmatpush1.msra.mxu1 %v437_v54  ;;  %v318_v13 = vld [vmem:[#allocation5 + $0x170] sm:$0xff]  ;;  %v425_v14 = vld [vmem:[#allocation7 + $0x20] sm:$0xff]  ;;  %v317_v15 = vld [vmem:[#allocation5 + $0x168] sm:$0xff] }
  0x70   : > { %374 = vmatprep.subr.mxu0 %v277_v31  ;;  %513 = vmatprep.subr.mxu1 %v436_v56  ;;  %v424_v16 = vld [vmem:[#allocation7 + $0x18] sm:$0xff]  ;;  %v316_v17 = vld [vmem:[#allocation5 + $0x160] sm:$0xff]  ;;  %v423_v18 = vld [vmem:[#allocation7 + $0x10] sm:$0xff] }
  0x71   : > { %375 = vmatpush1.msra.mxu0 %v276_v33  ;;  %514 = vmatpush1.msra.mxu1 %v435_v58  ;;  %v315_v19 = vld [vmem:[#allocation5 + $0x158] sm:$0xff]  ;;  %v422_v20 = vld [vmem:[#allocation7 + $0x8] sm:$0xff]  ;;  %v314_v21 = vld [vmem:[#allocation5 + $0x150] sm:$0xff] }
  0x72   : > { %376 = vmatprep.subr.mxu0 %v275_v35  ;;  %515 = vmatprep.subr.mxu1 %v434_v60  ;;  %v421_v22 = vld [vmem:[#allocation7] sm:$0xff]  ;;  %v313_v23 = vld [vmem:[#allocation5 + $0x148] sm:$0xff]  ;;  %v484_v24 = vld [vmem:[#allocation7 + $0x1f8] sm:$0xff] }
  0x73   : > { %377 = vmatpush1.msra.mxu0 %v274_v37  ;;  %516 = vmatpush1.msra.mxu1 %v433_v62  ;;  %v312_v25 = vld [vmem:[#allocation5 + $0x140] sm:$0xff]  ;;  %v483_v26 = vld [vmem:[#allocation7 + $0x1f0] sm:$0xff]  ;;  %v311_v27 = vld [vmem:[#allocation5 + $0x138] sm:$0xff] }
  0x74   : > { %378 = vmatprep.subr.mxu0 %v273_v39  ;;  %517 = vmatprep.subr.mxu1 %v432_v0  ;;  %v482_v28 = vld [vmem:[#allocation7 + $0x1e8] sm:$0xff]  ;;  %v310_v29 = vld [vmem:[#allocation5 + $0x130] sm:$0xff]  ;;  %v481_v30 = vld [vmem:[#allocation7 + $0x1e0] sm:$0xff] }
  0x75   : > { %379 = vmatpush1.msra.mxu0 %v272_v41  ;;  %518 = vmatpush1.msra.mxu1 %v431_v2  ;;  %v309_v31 = vld [vmem:[#allocation5 + $0x128] sm:$0xff]  ;;  %v480_v32 = vld [vmem:[#allocation7 + $0x1d8] sm:$0xff]  ;;  %v308_v33 = vld [vmem:[#allocation5 + $0x120] sm:$0xff]  ;;  %v338_v2 = vlaneseq }
  0x76   : > { %380 = vmatprep.subr.mxu0 %v335_v43  ;;  %519 = vmatprep.subr.mxu1 %v430_v4  ;;  %v479_v34 = vld [vmem:[#allocation7 + $0x1d0] sm:$0xff]  ;;  %v307_v35 = vld [vmem:[#allocation5 + $0x118] sm:$0xff]  ;;  %v478_v36 = vld [vmem:[#allocation7 + $0x1c8] sm:$0xff] }
  0x77   : > { %381 = vmatpush2.msra.mxu0 %v334_v45  ;;  %520 = vmatpush1.msra.mxu1 %v429_v6  ;;  %v306_v37 = vld [vmem:[#allocation5 + $0x110] sm:$0xff]  ;;  %v477_v38 = vld [vmem:[#allocation7 + $0x1c0] sm:$0xff]  ;;  %v305_v39 = vld [vmem:[#allocation5 + $0x108] sm:$0xff] }
  0x78   : > { %382 = vmatprep.subr.mxu0 %v333_v47  ;;  %521 = vmatprep.subr.mxu1 %v428_v8  ;;  %v476_v40 = vld [vmem:[#allocation7 + $0x1b8] sm:$0xff]  ;;  %v304_v41 = vld [vmem:[#allocation5 + $0x100] sm:$0xff]  ;;  %v475_v42 = vld [vmem:[#allocation7 + $0x1b0] sm:$0xff] }
  0x79   : > { %383 = vmatpush2.msra.mxu0 %v332_v49  ;;  %522 = vmatpush1.msra.mxu1 %v427_v10  ;;  %v270_v43 = vld [vmem:[%s1073_s17] sm:$0xff]  ;;  %v474_v44 = vld [vmem:[#allocation7 + $0x1a8] sm:$0xff]  ;;  %v472_v46 = vld [vmem:[#allocation7 + $0x198] sm:$0xff] }
  0x7a   : > { %384 = vmatprep.subr.mxu0 %v331_v51  ;;  %523 = vmatprep.subr.mxu1 %v426_v12  ;;  %v473_v45 = vld [vmem:[#allocation7 + $0x1a0] sm:$0xff]  ;;  %v471_v47 = vld [vmem:[#allocation7 + $0x190] sm:$0xff]  ;;  %v470_v48 = vld [vmem:[#allocation7 + $0x188] sm:$0xff] }
  0x7b   : > { %385 = vmatpush2.msra.mxu0 %v330_v53  ;;  %524 = vmatpush1.msra.mxu1 %v425_v14  ;;  %v469_v49 = vld [vmem:[#allocation7 + $0x180] sm:$0xff]  ;;  %v468_v50 = vld [vmem:[#allocation7 + $0x178] sm:$0xff]  ;;  %v467_v51 = vld [vmem:[#allocation7 + $0x170] sm:$0xff] }
  0x7c   : > { %386 = vmatprep.subr.mxu0 %v329_v55  ;;  %525 = vmatprep.subr.mxu1 %v424_v16  ;;  %v466_v52 = vld [vmem:[#allocation7 + $0x168] sm:$0xff]  ;;  %v465_v53 = vld [vmem:[#allocation7 + $0x160] sm:$0xff]  ;;  %v464_v54 = vld [vmem:[#allocation7 + $0x158] sm:$0xff] }
  0x7d   : > { %387 = vmatpush2.msra.mxu0 %v328_v57  ;;  %526 = vmatpush1.msra.mxu1 %v423_v18  ;;  %v463_v55 = vld [vmem:[#allocation7 + $0x150] sm:$0xff]  ;;  %v462_v56 = vld [vmem:[#allocation7 + $0x148] sm:$0xff]  ;;  %v461_v57 = vld [vmem:[#allocation7 + $0x140] sm:$0xff] }
  0x7e   : > { %388 = vmatprep.subr.mxu0 %v327_v59  ;;  %527 = vmatprep.subr.mxu1 %v422_v20  ;;  %v460_v58 = vld [vmem:[#allocation7 + $0x138] sm:$0xff]  ;;  %v459_v59 = vld [vmem:[#allocation7 + $0x130] sm:$0xff]  ;;  %v458_v60 = vld [vmem:[#allocation7 + $0x128] sm:$0xff] }
  0x7f   : > { %389 = vmatpush2.msra.mxu0 %v326_v61  ;;  %528 = vmatpush1.msra.mxu1 %v421_v22  ;;  %v457_v61 = vld [vmem:[#allocation7 + $0x120] sm:$0xff]  ;;  %v456_v62 = vld [vmem:[#allocation7 + $0x118] sm:$0xff]  ;;  %v454_v0 = vld [vmem:[#allocation7 + $0x108] sm:$0xff] }
  0x80   : > { %390 = vmatprep.subr.mxu0 %v325_v63  ;;  %529 = vmatprep.subr.mxu1 %v484_v24  ;;  %v455_v63 = vld [vmem:[#allocation7 + $0x110] sm:$0xff] }
  0x81   : > { %391 = vmatpush2.msra.mxu0 %v324_v1  ;;  %530 = vmatpush2.msra.mxu1 %v483_v26  ;;  %v453_v1 = vld [vmem:[#allocation7 + $0x100] sm:$0xff] }
  0x82   : > { %392 = vmatprep.subr.mxu0 %v323_v3  ;;  %531 = vmatprep.subr.mxu1 %v482_v28  ;;  %v339_v3 = vshrl.u32 %v338_v2, 7 }
  0x83   : > { %393 = vmatpush2.msra.mxu0 %v322_v5  ;;  %532 = vmatpush2.msra.mxu1 %v481_v30  ;;  %v336_v5 = vld [vmem:[%s1130_s2] sm:$0x3] }
  0x84   : > { %394 = vmatprep.subr.mxu0 %v321_v7  ;;  %533 = vmatprep.subr.mxu1 %v480_v32  ;;  %v340_v4 = vsub.s32 0, %v339_v3  ;;  %v344_v6 = vsub.s32 1, %v339_v3 }
  0x85   : > { %395 = vmatpush2.msra.mxu0 %v320_v9  ;;  %534 = vmatpush2.msra.mxu1 %v479_v34 }
  0x86   : > { %396 = vmatprep.subr.mxu0 %v319_v11  ;;  %535 = vmatprep.subr.mxu1 %v478_v36  ;;  %v341_v7 = vrot.slane %v336_v5, %v340_v4  ;;  %v345_v8 = vrot.slane %v336_v5, %v344_v6 }
  0x87   : > { %397 = vmatpush2.msra.mxu0 %v318_v13  ;;  %536 = vmatpush2.msra.mxu1 %v477_v38 }
  0x88   : > { %398 = vmatprep.subr.mxu0 %v317_v15  ;;  %537 = vmatprep.subr.mxu1 %v476_v40  ;;  %v485_v15 = vld [vmem:[%s1132_s4] sm:$0x3] }
  0x89   : > { %399 = vmatpush2.msra.mxu0 %v316_v17  ;;  %538 = vmatpush2.msra.mxu1 %v475_v42  ;;  %v490_v16 = vrot.slane %v485_v15, %v340_v4  ;;  %v494_v17 = vrot.slane %v485_v15, %v344_v6 }
  0x8a   : > { %400 = vmatprep.subr.mxu0 %v315_v19  ;;  %539 = vmatprep.subr.mxu1 %v474_v44 }
  0x8b   : > { %401 = vmatpush2.msra.mxu0 %v314_v21  ;;  %540 = vmatpush2.msra.mxu1 %v473_v45 }
  0x8c   : > { %402 = vmatprep.subr.mxu0 %v313_v23  ;;  %541 = vmatprep.subr.mxu1 %v472_v46 }
  0x8d   : > { %403 = vmatpush2.msra.mxu0 %v312_v25  ;;  %542 = vmatpush2.msra.mxu1 %v471_v47 }
  0x8e   : > { %404 = vmatprep.subr.mxu0 %v311_v27  ;;  %543 = vmatprep.subr.mxu1 %v470_v48 }
  0x8f   : > { %405 = vmatpush2.msra.mxu0 %v310_v29  ;;  %544 = vmatpush2.msra.mxu1 %v469_v49 }
  0x90   : > { %406 = vmatprep.subr.mxu0 %v309_v31  ;;  %545 = vmatprep.subr.mxu1 %v468_v50 }
  0x91   : > { %407 = vmatpush2.msra.mxu0 %v308_v33  ;;  %546 = vmatpush2.msra.mxu1 %v467_v51 }
  0x92   : > { %408 = vmatprep.subr.mxu0 %v307_v35  ;;  %547 = vmatprep.subr.mxu1 %v466_v52 }
  0x93   : > { %409 = vmatpush2.msra.mxu0 %v306_v37  ;;  %548 = vmatpush2.msra.mxu1 %v465_v53 }
  0x94   : > { %410 = vmatprep.subr.mxu0 %v305_v39  ;;  %549 = vmatprep.subr.mxu1 %v464_v54 }
  0x95   : > { %411 = vmatpush2.msra.mxu0 %v304_v41  ;;  %550 = vmatpush2.msra.mxu1 %v463_v55 }
  0x96   : > { %413 = vmatmul.mubr.f32.vlgmr.msra.gmra.mxu0 %v270_v43  ;;  %551 = vmatprep.subr.mxu1 %v462_v56 }
  0x97   : > { %552 = vmatpush2.msra.mxu1 %v461_v57 }
  0x98   : > { %553 = vmatprep.subr.mxu1 %v460_v58 }
  0x99   : > { %554 = vmatpush2.msra.mxu1 %v459_v59 }
  0x9a   : > { %555 = vmatprep.subr.mxu1 %v458_v60 }
  0x9b   : > { %556 = vmatpush2.msra.mxu1 %v457_v61 }
  0x9c   : > { %557 = vmatprep.subr.mxu1 %v456_v62 }
  0x9d   : > { %558 = vmatpush2.msra.mxu1 %v455_v63 }
  0x9e   : > { %559 = vmatprep.subr.mxu1 %v454_v0 }
  0x9f   : > { %560 = vmatpush2.msra.mxu1 %v453_v1 }
 0x156   : > { %v414_v9 = vpop.f32.mrf.mxu0 }
 0x157   : > { %v415_v10 = vadd.f32 %v414_v9, %v341_v7 }
 0x158   : > { %v416_v11 = vpop.f32.mrf.mxu0 }
 0x159   : > { %v417_v12 = vadd.f32 %v416_v11, %v345_v8  ;;  %v419_v14 = vmax.f32 %v415_v10, 0.0 }
 0x15b   : > { %v420_v13 = vmax.f32 %v417_v12, 0.0 }
 0x15d   : > { %561 = vmatprep.mubr.f32.mxu1 %v420_v13 }
 0x15e   : > { %562 = vmatmul.mubr.f32.vlgmr.msra.gmra.mxu1 %v419_v14 }
 0x21e   : > { %v563_v18 = vpop.f32.mrf.mxu1 }
 0x21f   : > { %v564_v19 = vadd.f32 %v563_v18, %v490_v16 }
 0x220   : > { %v565_v20 = vpop.f32.mrf.mxu1 }
 0x221   : > { %568 = vst [vmem:[%s269_s12] sm:$0xff] %v564_v19  ;;  %v566_v21 = vadd.f32 %v565_v20, %v494_v17 }
 0x223   : > { %569 = vst [vmem:[%s269_s12 + $0x8] sm:$0xff] %v566_v21 }
 0x224   : > { %856 = shalt.err (!%p853_p9)
}
 0x225   : > { %s857_s17 = scalar_lea.hbm %s583_s28, 256  ;;  %s861_s26 = scalar_lea.hbm %s1133_s5, 512 }
 0x226   : > { %p858_p13 = scmp.ne.s32.totalorder %s583_s28, %s857_s17  ;;  %p862_p4 = scmp.lt.s32.totalorder %s583_s28, %s1133_s5 }
 0x227   : > { %p863_p8 = scmp.lt.s32.totalorder %s861_s26, %s857_s17 }
 0x228   : > { %p859_p5 = pnand %p858_p13, %p1149_p0 }
 0x229   : > { %p864_p3 = por %p863_p8, %p862_p4 }
 0x22a   : > { %p860_p10 = pneg %p859_p5 }
 0x22c   : > { %p865_p11 = pnand %p864_p3, %p860_p10 }
 0x22e   : > { %868 = shalt.err (!%p865_p11)
}
 0x22f   : > { %704 = dma.vmem_to_hbm [thread:$0]  (%p1149_p0), %s586_s30, 256, %s583_s28, %s571_s7  }
 0x230 PF: > { %s597_s11 = sand.u32 1, %s899_s18   ;;  %p1150_p1 = scmp.ne.s32.totalorder %s1139_s25, 0 }
 0x231   : > { %p1151_p2 = scmp.ge.s32.totalorder %s911_s21, 2  ;;  %s598_s12 = scalar_lea.sflag [#allocation4], %s597_s11 }
 0x233   : > { %p718_p6 = pnand %p1151_p2, %p1150_p1 }
 0x235   : > { %p719_p12 = pneg %p718_p6 }
 0x237   : > { %894 = dma.done.wait (%p719_p12), %s598_s12, 256  }
 0x238   : > { %896 = vsyncadd (%p719_p12), %s598_s12, 4294967040  ;;  %p19_p7 = scmp.ge.s32.totalorder %s1021_s15, 4   ;;  %s1152_s18 = smov %s903_s19 }
 0x239   : > { %s1153_s19 = smov %s907_s20  ;;  %s1154_s20 = smov %s1037_s27 }
 0x23a   : > { %s1155_s21 = smov %s1021_s15  ;;  %21 = sbr.rel (!%p19_p7) target bundleno = 6 (0x6), region = 93 }
 0x23f   :  { %603 = vsyncpa [#allocation3], 1 }
 0x240   :  { %605 = vsyncpa [#allocation3 + $0x1], 1 }
 0x241   :  { %606 = vsyncpa [#allocation6], 1 }
 0x242   :  { %607 = vsyncpa [#allocation4], 1 }
 0x243   :  { %609 = vsyncpa [#allocation4 + $0x1], 1 }

</bundles_post_ra>
